<compile_context>
chip_gen: v5e
topology: v5e:2x2
jax: 0.10.0
libtpu: 0.0.40
codegen_flags: <defaults>
</compile_context>

<pallas_src>
import functools
import math

import jax
import jax.numpy as jnp
from jax.experimental import pallas as pl
from jax.experimental.pallas import tpu as pltpu


def _round_up(x, m):
    return (x + m - 1) // m * m


_VMEM_LIMIT = 48 * 1024 * 1024   # <= v7x 64 MiB physical; plenty on v5e/v6e.


def _cparams(dims):
    return pltpu.CompilerParams(dimension_semantics=dims,
                                vmem_limit_bytes=_VMEM_LIMIT)


# ============================================================================
# Pallas kernels
# ============================================================================

# ---- tiled GEMM: y = relu?(x @ w + b) --------------------------------------

def _matmul_kernel(x_ref, w_ref, b_ref, o_ref, acc_ref, *, relu):
    @pl.when(pl.program_id(2) == 0)
    def _init():
        acc_ref[...] = jnp.zeros_like(acc_ref)

    acc_ref[...] += jnp.dot(x_ref[...], w_ref[...],
                            preferred_element_type=jnp.float32)

    @pl.when(pl.program_id(2) == pl.num_programs(2) - 1)
    def _fin():
        y = acc_ref[...] + b_ref[...]
        if relu:
            y = jnp.maximum(y, 0.0)
        o_ref[...] = y.astype(o_ref.dtype)


def linear(x, w, b, relu=False, out_dtype=jnp.bfloat16):
    """(..., K) @ (K, N) + (N,) with a tiled, bf16, pipelined Pallas GEMM."""
    lead = x.shape[:-1]
    K = x.shape[-1]
    N = w.shape[-1]
    x2 = x.reshape(-1, K).astype(jnp.bfloat16)
    w2 = w.astype(jnp.bfloat16)
    M = x2.shape[0]

    tm = min(512, _round_up(M, 8))
    tn = min(1024, _round_up(N, 128))
    tk = min(512, _round_up(K, 128))
    Mp, Kp, Np = _round_up(M, tm), _round_up(K, tk), _round_up(N, tn)
    if (Mp, Kp) != (M, K):
        x2 = jnp.pad(x2, ((0, Mp - M), (0, Kp - K)))
    if (Kp, Np) != (K, N):
        w2 = jnp.pad(w2, ((0, Kp - K), (0, Np - N)))
    b2 = jnp.pad(b.astype(jnp.float32).reshape(1, N), ((0, 0), (0, Np - N)))

    out = pl.pallas_call(
        functools.partial(_matmul_kernel, relu=relu),
        grid=(Mp // tm, Np // tn, Kp // tk),
        in_specs=[pl.BlockSpec((tm, tk), lambda i, j, k: (i, k)),
                  pl.BlockSpec((tk, tn), lambda i, j, k: (k, j)),
                  pl.BlockSpec((1, tn), lambda i, j, k: (0, j))],
        out_specs=pl.BlockSpec((tm, tn), lambda i, j, k: (i, j)),
        out_shape=jax.ShapeDtypeStruct((Mp, Np), out_dtype),
        scratch_shapes=[pltpu.VMEM((tm, tn), jnp.float32)],
        compiler_params=_cparams(("parallel", "parallel", "arbitrary")),
    )(x2, w2, b2)
    return out[:M, :N].reshape(lead + (N,))


# ---- GEMM with fused residual-add + LayerNorm epilogue ----------------------

def _matmul_res_ln_kernel(x_ref, w_ref, b_ref, r_ref, g_ref, bt_ref, o_ref,
                          acc_ref, *, n_true, eps):
    @pl.when(pl.program_id(1) == 0)
    def _init():
        acc_ref[...] = jnp.zeros_like(acc_ref)

    acc_ref[...] += jnp.dot(x_ref[...], w_ref[...],
                            preferred_element_type=jnp.float32)

    @pl.when(pl.program_id(1) == pl.num_programs(1) - 1)
    def _fin():
        # Padded columns of y are exactly zero (zero-padded w, bias, residual),
        # so sum/sum-of-squares over the tile equal the sums over the true N.
        y = acc_ref[...] + b_ref[...] + r_ref[...].astype(jnp.float32)
        inv_n = 1.0 / n_true
        mu = jnp.sum(y, axis=-1, keepdims=True) * inv_n
        var = jnp.maximum(
            jnp.sum(y * y, axis=-1, keepdims=True) * inv_n - mu * mu, 0.0)
        o_ref[...] = ((y - mu) * jax.lax.rsqrt(var + eps) * g_ref[...]
                      + bt_ref[...]).astype(o_ref.dtype)


def linear_res_ln(x, w, b, residual, gamma, beta, eps=1e-5,
                  out_dtype=jnp.bfloat16):
    """y = LayerNorm((x @ w + b) + residual); the residual add and LN run in
    the GEMM finalize (the full output row fits one N tile)."""
    lead = x.shape[:-1]
    K = x.shape[-1]
    N = w.shape[-1]
    x2 = x.reshape(-1, K).astype(jnp.bfloat16)
    r2 = residual.reshape(-1, N).astype(jnp.bfloat16)
    w2 = w.astype(jnp.bfloat16)
    M = x2.shape[0]

    tm = min(512, _round_up(M, 8))
    tk = min(512, _round_up(K, 128))
    Np = _round_up(N, 128)
    Mp, Kp = _round_up(M, tm), _round_up(K, tk)
    if (Mp, Kp) != (M, K):
        x2 = jnp.pad(x2, ((0, Mp - M), (0, Kp - K)))
    if (Kp, Np) != (K, N):
        w2 = jnp.pad(w2, ((0, Kp - K), (0, Np - N)))
    if (Mp, Np) != (M, N):
        r2 = jnp.pad(r2, ((0, Mp - M), (0, Np - N)))
    pad_n = ((0, 0), (0, Np - N))
    b2 = jnp.pad(b.astype(jnp.float32).reshape(1, N), pad_n)
    g2 = jnp.pad(gamma.astype(jnp.float32).reshape(1, N), pad_n)
    bt2 = jnp.pad(beta.astype(jnp.float32).reshape(1, N), pad_n)

    out = pl.pallas_call(
        functools.partial(_matmul_res_ln_kernel, n_true=float(N), eps=eps),
        grid=(Mp // tm, Kp // tk),
        in_specs=[pl.BlockSpec((tm, tk), lambda i, k: (i, k)),
                  pl.BlockSpec((tk, Np), lambda i, k: (k, 0)),
                  pl.BlockSpec((1, Np), lambda i, k: (0, 0)),
                  pl.BlockSpec((tm, Np), lambda i, k: (i, 0)),
                  pl.BlockSpec((1, Np), lambda i, k: (0, 0)),
                  pl.BlockSpec((1, Np), lambda i, k: (0, 0))],
        out_specs=pl.BlockSpec((tm, Np), lambda i, k: (i, 0)),
        out_shape=jax.ShapeDtypeStruct((Mp, Np), out_dtype),
        scratch_shapes=[pltpu.VMEM((tm, Np), jnp.float32)],
        compiler_params=_cparams(("parallel", "arbitrary")),
    )(x2, w2, b2, r2, g2, bt2)
    return out[:M, :N].reshape(lead + (N,))


# ---- flash attention: head-batched, online softmax --------------------------

def _attn_init(acc_ref, m_ref, l_ref):
    acc_ref[...] = jnp.zeros_like(acc_ref)
    m_ref[...] = jnp.full_like(m_ref, -1e30)
    l_ref[...] = jnp.zeros_like(l_ref)


def _attn_finalize(o_ref, acc_ref, l_ref):
    inv = pl.reciprocal(l_ref[...], approx=True)
    o_ref[0] = (acc_ref[...] * inv).astype(o_ref.dtype)


def _online_softmax_update(q, k, v, bias, scale, acc_ref, m_ref, l_ref):
    # q: (H, Lq, dh), k/v: (H, tk, dh); one batched MXU stream over all heads.
    s = jax.lax.dot_general(q, k, (((2,), (2,)), ((0,), (0,))),
                            preferred_element_type=jnp.float32) * scale
    if bias is not None:
        s = s + bias
    m_old = m_ref[...]
    m_new = jnp.maximum(m_old, jnp.max(s, axis=-1, keepdims=True))
    alpha = jnp.exp(m_old - m_new)
    p = jnp.exp(s - m_new)
    l_ref[...] = alpha * l_ref[...] + jnp.sum(p, axis=-1, keepdims=True)
    pv = jax.lax.dot_general(p.astype(v.dtype), v,
                             (((2,), (1,)), ((0,), (0,))),
                             preferred_element_type=jnp.float32)
    acc_ref[...] = alpha * acc_ref[...] + pv
    m_ref[...] = m_new


def _flash_attn_masked_kernel(q_ref, k_ref, v_ref, am_ref, o_ref,
                              acc_ref, m_ref, l_ref, *, scale):
    t = pl.program_id(1)

    @pl.when(t == 0)
    def _init():
        _attn_init(acc_ref, m_ref, l_ref)

    # bf16 mask logits; sigmoid(x) < 0.5  <=>  x < 0  -> masked.  The finite
    # -1e9 bias reproduces the reference "fully-masked row attends everywhere"
    # fix-up (softmax of a uniformly shifted row is unchanged).
    bias = jnp.where(am_ref[0] < 0, -1e9, 0.0).astype(jnp.float32)
    _online_softmax_update(q_ref[0], k_ref[0], v_ref[0], bias, scale,
                           acc_ref, m_ref, l_ref)

    @pl.when(t == pl.num_programs(1) - 1)
    def _fin():
        _attn_finalize(o_ref, acc_ref, l_ref)


def _flash_attn_nomask_kernel(q_ref, k_ref, v_ref, o_ref,
                              acc_ref, m_ref, l_ref, *, scale, kv_valid, tk):
    t = pl.program_id(1)

    @pl.when(t == 0)
    def _init():
        _attn_init(acc_ref, m_ref, l_ref)

    bias = None
    if kv_valid is not None:           # mask out padded KV columns in-kernel
        col = t * tk + jax.lax.broadcasted_iota(jnp.int32, (1, tk), 1)
        bias = jnp.where(col < kv_valid, 0.0, -1e30).astype(jnp.float32)
    _online_softmax_update(q_ref[0], k_ref[0], v_ref[0], bias, scale,
                           acc_ref, m_ref, l_ref)

    @pl.when(t == pl.num_programs(1) - 1)
    def _fin():
        _attn_finalize(o_ref, acc_ref, l_ref)


def flash_attention(q, k, v, mask_logits, scale, nheads):
    """q:(B,Lq,D), k/v:(B,Lk,D).  mask_logits: None or (B,Lq,Lk) bf16 logits
    (position is masked where logit < 0).  Heads are batched inside the kernel
    (head-major layout) so every per-KV-tile update is a full-width vector op.
    Grid stays (B, KV-tiles): splitting heads onto the grid would only add
    ~0.35us/step overhead since all heads share one MXU stream here."""
    B, Lq, D = q.shape
    Lk = k.shape[1]
    dh = D // nheads
    tk = min(2048, _round_up(Lk, 128))
    Lkp = _round_up(Lk, tk)

    q = q.astype(jnp.bfloat16)
    k = k.astype(jnp.bfloat16)
    v = v.astype(jnp.bfloat16)
    if Lkp != Lk:
        k = jnp.pad(k, ((0, 0), (0, Lkp - Lk), (0, 0)))
        v = jnp.pad(v, ((0, 0), (0, Lkp - Lk), (0, 0)))
    qh = q.reshape(B, Lq, nheads, dh).transpose(0, 2, 1, 3)
    kh = k.reshape(B, Lkp, nheads, dh).transpose(0, 2, 1, 3)
    vh = v.reshape(B, Lkp, nheads, dh).transpose(0, 2, 1, 3)

    qkv_specs = [pl.BlockSpec((1, nheads, Lq, dh), lambda b, t: (b, 0, 0, 0)),
                 pl.BlockSpec((1, nheads, tk, dh), lambda b, t: (b, 0, t, 0)),
                 pl.BlockSpec((1, nheads, tk, dh), lambda b, t: (b, 0, t, 0))]

    if mask_logits is not None:
        am = mask_logits.astype(jnp.bfloat16)
        if Lkp != Lk:
            am = jnp.pad(am, ((0, 0), (0, 0), (0, Lkp - Lk)),
                         constant_values=-1.0)
        kernel = functools.partial(_flash_attn_masked_kernel, scale=scale)
        in_specs = qkv_specs + [
            pl.BlockSpec((1, Lq, tk), lambda b, t: (b, 0, t))]
        args = (qh, kh, vh, am)
    else:
        kernel = functools.partial(
            _flash_attn_nomask_kernel, scale=scale,
            kv_valid=(Lk if Lkp != Lk else None), tk=tk)
        in_specs = qkv_specs
        args = (qh, kh, vh)

    out = pl.pallas_call(
        kernel,
        grid=(B, Lkp // tk),
        in_specs=in_specs,
        out_specs=pl.BlockSpec((1, nheads, Lq, dh), lambda b, t: (b, 0, 0, 0)),
        out_shape=jax.ShapeDtypeStruct((B, nheads, Lq, dh), jnp.bfloat16),
        scratch_shapes=[pltpu.VMEM((nheads, Lq, dh), jnp.float32),
                        pltpu.VMEM((nheads, Lq, 1), jnp.float32),
                        pltpu.VMEM((nheads, Lq, 1), jnp.float32)],
        compiler_params=_cparams(("parallel", "arbitrary")),
    )(*args)
    return out.transpose(0, 2, 1, 3).reshape(B, Lq, D)


# ---- layer norm (standalone; only used where no GEMM precedes it) ----------

def _ln_kernel(x_ref, g_ref, b_ref, o_ref, *, eps):
    x = x_ref[...].astype(jnp.float32)
    mu = jnp.mean(x, axis=-1, keepdims=True)
    xc = x - mu
    var = jnp.mean(xc * xc, axis=-1, keepdims=True)
    o_ref[...] = (xc * jax.lax.rsqrt(var + eps) * g_ref[...]
                  + b_ref[...]).astype(o_ref.dtype)


def layer_norm(x, gamma, beta, eps=1e-5, out_dtype=jnp.bfloat16):
    lead = x.shape[:-1]
    D = x.shape[-1]
    x2 = x.reshape(-1, D).astype(jnp.bfloat16)
    M = x2.shape[0]
    tm = min(1024, _round_up(M, 8))
    Mp = _round_up(M, tm)
    if Mp != M:
        x2 = jnp.pad(x2, ((0, Mp - M), (0, 0)))
    out = pl.pallas_call(
        functools.partial(_ln_kernel, eps=eps),
        grid=(Mp // tm,),
        in_specs=[pl.BlockSpec((tm, D), lambda i: (i, 0)),
                  pl.BlockSpec((1, D), lambda i: (0, 0)),
                  pl.BlockSpec((1, D), lambda i: (0, 0))],
        out_specs=pl.BlockSpec((tm, D), lambda i: (i, 0)),
        out_shape=jax.ShapeDtypeStruct((Mp, D), out_dtype),
        compiler_params=pltpu.CompilerParams(
            dimension_semantics=("parallel",)),
    )(x2, gamma.reshape(1, D).astype(jnp.float32),
      beta.reshape(1, D).astype(jnp.float32))
    return out[:M].reshape(lead + (D,))


# ---- group norm (tiled stats pass + fused scale/shift(+add)(+ReLU)) ---------

def _gn_stats_kernel(x_ref, m_ref, o_ref):
    @pl.when(pl.program_id(1) == 0)
    def _init():
        o_ref[...] = jnp.zeros_like(o_ref)
    x = x_ref[0].astype(jnp.float32)                       # (tsp, C)
    m = m_ref[...]                                         # (C, G)
    s = jnp.sum(jnp.dot(x, m, preferred_element_type=jnp.float32),
                axis=0, keepdims=True)                     # (1, G)
    ss = jnp.sum(jnp.dot(x * x, m, preferred_element_type=jnp.float32),
                 axis=0, keepdims=True)                    # (1, G)
    o_ref[...] = o_ref[...] + jnp.concatenate([s, ss], axis=0)[None, :, :]


def _gn_norm_kernel(x_ref, sc_ref, sh_ref, o_ref, *, relu):
    y = x_ref[0].astype(jnp.float32) * sc_ref[0] + sh_ref[0]
    if relu:
        y = jnp.maximum(y, 0.0)
    o_ref[0] = y.astype(o_ref.dtype)


def _gn_norm_add_kernel(x_ref, a_ref, sc_ref, sh_ref, o_ref, *, relu):
    y = (x_ref[0].astype(jnp.float32) * sc_ref[0] + sh_ref[0]
         + a_ref[0].astype(jnp.float32))
    if relu:
        y = jnp.maximum(y, 0.0)
    o_ref[0] = y.astype(o_ref.dtype)


def group_norm(x_nhwc, gamma, beta, num_groups, eps=1e-5, relu=False,
               add=None, out_dtype=jnp.bfloat16):
    """GroupNorm over contiguous channel groups; the optional post-norm add
    (FPN skip) and ReLU are fused into the scale/shift pass."""
    # TODO(synk): the scale/shift pass could be fused further into the consumer
    # (conv3x3 / mask-feature linear) to save one more HBM round trip.
    B, H, W, C = x_nhwc.shape
    G = num_groups
    Cg = C // G
    HW = H * W
    x = x_nhwc.reshape(B, HW, C).astype(jnp.bfloat16)
    tsp = min(1024, _round_up(HW, 8))
    HWp = _round_up(HW, tsp)
    if HWp != HW:
        x = jnp.pad(x, ((0, 0), (0, HWp - HW), (0, 0)))
    nsp = HWp // tsp
    mgrp = (jnp.arange(C)[:, None] // Cg
            == jnp.arange(G)[None, :]).astype(jnp.float32)      # (C, G)

    stats = pl.pallas_call(
        _gn_stats_kernel,
        grid=(B, nsp),
        in_specs=[pl.BlockSpec((1, tsp, C), lambda b, t: (b, t, 0)),
                  pl.BlockSpec((C, G), lambda b, t: (0, 0))],
        out_specs=pl.BlockSpec((1, 2, G), lambda b, t: (b, 0, 0)),
        out_shape=jax.ShapeDtypeStruct((B, 2, G), jnp.float32),
        compiler_params=pltpu.CompilerParams(
            dimension_semantics=("parallel", "arbitrary")),
    )(x, mgrp)

    inv_count = 1.0 / float(HW * Cg)
    mean_g = stats[:, 0, :] * inv_count                         # (B, G)
    var_g = jnp.maximum(stats[:, 1, :] * inv_count - mean_g * mean_g, 0.0)
    rstd_g = jax.lax.rsqrt(var_g + eps)
    gamma32 = gamma.astype(jnp.float32)[None]
    beta32 = beta.astype(jnp.float32)[None]
    scale_c = jnp.repeat(rstd_g, Cg, axis=1) * gamma32          # (B, C)
    shift_c = beta32 - jnp.repeat(mean_g, Cg, axis=1) * scale_c

    args = [x]
    in_specs = [pl.BlockSpec((1, tsp, C), lambda b, t: (b, t, 0))]
    if add is not None:
        a = add.reshape(B, HW, C).astype(jnp.bfloat16)
        if HWp != HW:
            a = jnp.pad(a, ((0, 0), (0, HWp - HW), (0, 0)))
        args.append(a)
        in_specs.append(pl.BlockSpec((1, tsp, C), lambda b, t: (b, t, 0)))
        kernel = functools.partial(_gn_norm_add_kernel, relu=relu)
    else:
        kernel = functools.partial(_gn_norm_kernel, relu=relu)
    args += [scale_c.reshape(B, 1, C), shift_c.reshape(B, 1, C)]
    in_specs += [pl.BlockSpec((1, 1, C), lambda b, t: (b, 0, 0)),
                 pl.BlockSpec((1, 1, C), lambda b, t: (b, 0, 0))]

    y = pl.pallas_call(
        kernel,
        grid=(B, nsp),
        in_specs=in_specs,
        out_specs=pl.BlockSpec((1, tsp, C), lambda b, t: (b, t, 0)),
        out_shape=jax.ShapeDtypeStruct((B, HWp, C), out_dtype),
        compiler_params=pltpu.CompilerParams(
            dimension_semantics=("parallel", "parallel")),
    )(*args)
    return y[:, :HW, :].reshape(B, H, W, C)


# ---- 3x3 conv: R output rows per grid step, taps shifted via the XLU --------

def _conv3x3_kernel(xa_ref, xb_ref, w_ref, b_ref, o_ref, *, R, W, Cout):
    Wp = W + 2

    def in_row(j):                     # local padded row j in [0, R + 2)
        return xa_ref[0, j] if j < R else xb_ref[0, j - R]

    bias = b_ref[0]
    for i in range(R):                 # output row i of this block
        acc = jnp.zeros((Wp, Cout), jnp.float32)
        for dy in range(3):
            z = jnp.dot(in_row(i + dy), w_ref[dy],
                        preferred_element_type=jnp.float32)    # (Wp, 3*Cout)
            for dx in range(3):
                part = z[:, dx * Cout:(dx + 1) * Cout]
                if dx:
                    # shift by -dx along the sublane axis through the XLU
                    part = pltpu.roll(part, shift=Wp - dx, axis=0)
                acc = acc + part
        o_ref[0, i] = (acc[:W, :] + bias).astype(o_ref.dtype)


def conv3x3(x, w, b, rows_per_step=8, out_dtype=jnp.bfloat16):
    """3x3 'same' conv, NHWC, w: (3,3,Cin,Cout).  R output rows per grid step;
    the R+2 input rows come from two block streams of the same padded array
    (main R-row block + 2-row halo), so there is no 3x duplicated row DMA and
    no im2col blow-up."""
    B, H, W, Cin = x.shape
    Cout = w.shape[-1]
    R = rows_per_step
    Hp = _round_up(H, R)
    # wk[dy][:, dx*Cout:(dx+1)*Cout] == w[dy, dx]
    wk = jnp.transpose(w.astype(jnp.bfloat16), (0, 2, 1, 3)).reshape(
        3, Cin, 3 * Cout)
    xp = jnp.pad(x.astype(jnp.bfloat16),
                 ((0, 0), (1, 1 + Hp - H), (1, 1), (0, 0)))
    Wp = W + 2
    out = pl.pallas_call(
        functools.partial(_conv3x3_kernel, R=R, W=W, Cout=Cout),
        grid=(B, Hp // R),
        in_specs=[
            pl.BlockSpec((1, R, Wp, Cin), lambda b, r: (b, r, 0, 0)),
            pl.BlockSpec((1, 2, Wp, Cin),
                         lambda b, r: (b, (r + 1) * (R // 2), 0, 0)),
            pl.BlockSpec((3, Cin, 3 * Cout), lambda b, r: (0, 0, 0)),
            pl.BlockSpec((1, Cout), lambda b, r: (0, 0)),
        ],
        out_specs=pl.BlockSpec((1, R, W, Cout), lambda b, r: (b, r, 0, 0)),
        out_shape=jax.ShapeDtypeStruct((B, Hp, W, Cout), out_dtype),
        compiler_params=_cparams(("parallel", "parallel")),
    )(xp, xp, wk, b.astype(jnp.float32).reshape(1, Cout))
    return out[:, :H]


# ---- mask einsum: 'bqc,bchw->bqhw', tiled over the pixel axis ---------------

def _mask_einsum_kernel(a_ref, b_ref, o_ref):
    o_ref[0] = jax.lax.dot_general(
        a_ref[0], b_ref[0], (((1,), (1,)), ((), ())),
        preferred_element_type=jnp.float32).astype(o_ref.dtype)


def mask_einsum(me, mfeat):
    """(B,Q,C) x (B,HW,C) -> (B,Q,HW); contracts on the channel axis directly
    so mask features never need a (B,C,HW) transpose in HBM."""
    B, Q, C = me.shape
    HW = mfeat.shape[1]
    tn = min(2048, _round_up(HW, 128))
    HWp = _round_up(HW, tn)
    mfeat = mfeat.astype(jnp.bfloat16)
    if HWp != HW:
        mfeat = jnp.pad(mfeat, ((0, 0), (0, HWp - HW), (0, 0)))
    out = pl.pallas_call(
        _mask_einsum_kernel,
        grid=(B, HWp // tn),
        in_specs=[pl.BlockSpec((1, Q, C), lambda b, t: (b, 0, 0)),
                  pl.BlockSpec((1, tn, C), lambda b, t: (b, t, 0))],
        out_specs=pl.BlockSpec((1, Q, tn), lambda b, t: (b, 0, t)),
        out_shape=jax.ShapeDtypeStruct((B, Q, HWp), jnp.float32),
        compiler_params=_cparams(("parallel", "parallel")),
    )(me.astype(jnp.bfloat16), mfeat)
    return out[:, :, :HW]


# ============================================================================
# Glue helpers (plain JAX)
# ============================================================================

def sine_pos_embed(B, H, W, num_pos_feats, temperature=10000.0, eps=1e-6):
    """SinePositionalEncoding (normalize=True) -> (B, H, W, 2*num_pos_feats)."""
    scale = 2.0 * math.pi
    y_embed = jnp.arange(1, H + 1, dtype=jnp.float32)[:, None] * jnp.ones((1, W))
    x_embed = jnp.ones((H, 1)) * jnp.arange(1, W + 1, dtype=jnp.float32)[None, :]
    y_embed = y_embed / (y_embed[-1:, :] + eps) * scale
    x_embed = x_embed / (x_embed[:, -1:] + eps) * scale
    dim_t = jnp.arange(num_pos_feats, dtype=jnp.float32)
    dim_t = temperature ** (2.0 * (dim_t // 2) / num_pos_feats)
    pos_x = x_embed[:, :, None] / dim_t
    pos_y = y_embed[:, :, None] / dim_t
    pos_x = jnp.stack([jnp.sin(pos_x[:, :, 0::2]),
                       jnp.cos(pos_x[:, :, 1::2])], axis=3).reshape(H, W, -1)
    pos_y = jnp.stack([jnp.sin(pos_y[:, :, 0::2]),
                       jnp.cos(pos_y[:, :, 1::2])], axis=3).reshape(H, W, -1)
    pos = jnp.concatenate([pos_y, pos_x], axis=-1)
    return jnp.broadcast_to(pos[None], (B, H, W, pos.shape[-1]))


def grid_sample_bilinear(img, grid):
    """F.grid_sample(mode=bilinear, padding=zeros, align_corners=False).
    img: (N, C, H, W), grid: (N, P, Q, 2) with (x, y) in [-1, 1]."""
    img = img.astype(jnp.float32)
    N, C, H, W = img.shape
    x = (grid[..., 0] + 1.0) * W * 0.5 - 0.5
    y = (grid[..., 1] + 1.0) * H * 0.5 - 0.5
    x0 = jnp.floor(x)
    y0 = jnp.floor(y)

    def gather(ix, iy):
        valid = ((ix >= 0) & (ix < W) & (iy >= 0) & (iy < H)).astype(jnp.float32)
        ixc = jnp.clip(ix, 0, W - 1).astype(jnp.int32)
        iyc = jnp.clip(iy, 0, H - 1).astype(jnp.int32)

        def one(im, iyy, ixx, vv):
            return im[:, iyy, ixx] * vv[None]

        return jax.vmap(one)(img, iyc, ixc, valid)  # (N, C, P, Q)

    g00 = gather(x0, y0)
    g01 = gather(x0 + 1.0, y0)
    g10 = gather(x0, y0 + 1.0)
    g11 = gather(x0 + 1.0, y0 + 1.0)
    wx1 = (x - x0)[:, None]
    wx0 = 1.0 - wx1
    wy1 = (y - y0)[:, None]
    wy0 = 1.0 - wy1
    return g00 * wx0 * wy0 + g01 * wx1 * wy0 + g10 * wx0 * wy1 + g11 * wx1 * wy1


def get_reference_points(shapes, B):
    refs = []
    for (H, W) in shapes:
        ry = (jnp.arange(H, dtype=jnp.float32) + 0.5) / H
        rx = (jnp.arange(W, dtype=jnp.float32) + 0.5) / W
        yy, xx = jnp.meshgrid(ry, rx, indexing='ij')
        refs.append(jnp.stack([xx.reshape(-1), yy.reshape(-1)], axis=-1))
    ref = jnp.concatenate(refs, axis=0)
    L = ref.shape[0]
    return jnp.broadcast_to(ref[None, :, None, :], (B, L, len(shapes), 2))


# ============================================================================
# Multi-scale deformable attention (encoder)
# ============================================================================

def ms_deform_attn_core(value, spatial_shapes, sampling_locations,
                        attention_weights, nheads):
    B, L, H, dh = value.shape
    _, Lq, _, nlev, P, _ = sampling_locations.shape
    value_list = []
    idx = 0
    for (Hl, Wl) in spatial_shapes:
        value_list.append(value[:, idx:idx + Hl * Wl])
        idx += Hl * Wl
    sampling_grids = 2.0 * sampling_locations - 1.0
    sampled = []
    # TODO(synk): the bilinear grid-sample is a data-dependent gather with no
    # clean Pallas equivalent on TPU; it stays in plain JAX (XLA gather).
    for lid, (Hl, Wl) in enumerate(spatial_shapes):
        v = value_list[lid].reshape(B, Hl * Wl, H * dh)
        v = v.transpose(0, 2, 1).reshape(B * H, dh, Hl, Wl)
        grid = sampling_grids[:, :, :, lid].transpose(0, 2, 1, 3, 4)
        grid = grid.reshape(B * H, Lq, P, 2)
        sampled.append(grid_sample_bilinear(v, grid))          # (B*H, dh, Lq, P)
    sampled = jnp.stack(sampled, axis=-2).reshape(B * H, dh, Lq, nlev * P)
    attn = attention_weights.transpose(0, 2, 1, 3, 4).reshape(B * H, Lq, nlev * P)
    out = (sampled * attn[:, None]).sum(-1)                     # (B*H, dh, Lq)
    return out.reshape(B, H * dh, Lq).transpose(0, 2, 1)        # (B, Lq, D)


def ms_deform_attn(query, value_src, reference_points, spatial_shapes,
                   p, nheads, nlev, npoints):
    """Returns the pre-out-projection attention output; the output projection
    is fused with residual+LN by the caller (linear_res_ln)."""
    B, L, D = query.shape
    dh = D // nheads
    value = linear(value_src, p['value_w'], p['value_b']).reshape(B, L, nheads, dh)
    offsets = linear(query, p['off_w'], p['off_b']).astype(jnp.float32)
    offsets = offsets.reshape(B, L, nheads, nlev, npoints, 2)
    aw = linear(query, p['attn_w'], p['attn_b']).astype(jnp.float32)
    aw = aw.reshape(B, L, nheads, nlev * npoints)
    aw = jax.nn.softmax(aw, axis=-1).reshape(B, L, nheads, nlev, npoints)
    offset_norm = jnp.array([[w, h] for (h, w) in spatial_shapes], jnp.float32)
    loc = (reference_points[:, :, None, :, None, :] +
           offsets / offset_norm[None, None, None, :, None, :])
    return ms_deform_attn_core(value, spatial_shapes, loc, aw, nheads)


def encoder_layer(src, pos, ref, shapes, p, cfg):
    q = src + pos
    attn = ms_deform_attn(q, src, ref, shapes, p['attn'],
                          cfg['nheads'], cfg['num_levels'], cfg['num_points'])
    # out-projection + residual + LayerNorm fused into one GEMM epilogue
    src = linear_res_ln(attn, p['attn']['out_w'], p['attn']['out_b'], src,
                        p['norm1_g'], p['norm1_b'])
    hidden = linear(src, p['ffn1_w'], p['ffn1_b'], relu=True)
    src = linear_res_ln(hidden, p['ffn2_w'], p['ffn2_b'], src,
                        p['norm2_g'], p['norm2_b'])
    return src


# ============================================================================
# MSDeformAttnPixelDecoder.forward_features
# ============================================================================

def pixel_decoder_forward(features, params, cfg):
    conv_dim = cfg['conv_dim']
    G = cfg['gn_groups']
    trans_feats = ['res5', 'res4', 'res3']            # coarse -> fine
    srcs, poss, shapes = [], [], []
    for idx, name in enumerate(trans_feats):
        x = features[name]
        B, H, W, _ = x.shape
        p = params['input_proj'][idx]
        y = linear(x, p['w'], p['b'])                  # 1x1 conv
        y = group_norm(y, p['gn_g'], p['gn_b'], G)
        srcs.append(y)
        poss.append(sine_pos_embed(B, H, W, conv_dim // 2))
        shapes.append((H, W))

    src_flat, pos_flat = [], []
    for lvl, (s, pe) in enumerate(zip(srcs, poss)):
        B, H, W, C = s.shape
        src_flat.append(s.reshape(B, H * W, C))
        pos_flat.append(pe.reshape(B, H * W, C)
                        + params['level_embed'][lvl][None, None, :])
    src = jnp.concatenate(src_flat, axis=1)
    pos = jnp.concatenate(pos_flat, axis=1)
    ref = get_reference_points(shapes, src.shape[0])

    for lp in params['enc_layers']:
        src = encoder_layer(src, pos, ref, shapes, lp, cfg)

    outs = []
    start = 0
    for (H, W) in shapes:
        hw = H * W
        outs.append(src[:, start:start + hw, :].reshape(-1, H, W, conv_dim))
        start += hw

    # FPN fusion with res2 (stride 4)
    x2 = features['res2']
    B, H2, W2, _ = x2.shape
    p = params['lateral']
    up = jax.image.resize(outs[-1], (B, H2, W2, conv_dim),
                          method='bilinear', antialias=False)
    # lateral 1x1 conv -> GroupNorm with the FPN skip-add fused in-kernel
    y = group_norm(linear(x2, p['w'], p['b']), p['gn_g'], p['gn_b'], G, add=up)
    p = params['output']
    y = conv3x3(y, p['w'], p['b'])
    y = group_norm(y, p['gn_g'], p['gn_b'], G, relu=True)   # GN + ReLU fused

    mask_features = linear(y, params['mask_feat_w'], params['mask_feat_b'])
    multi_scale_features = outs[:3]                    # strides 32, 16, 8
    return mask_features, outs[0], multi_scale_features


# ============================================================================
# MultiScaleMaskedTransformerDecoder (predictor)
# ============================================================================

def mha(q_in, k_in, v_in, mask_logits, p, nheads):
    """q/k/v projections + flash attention.  Returns the pre-out-projection
    attention output; the output projection is fused with residual+LN by the
    caller (linear_res_ln)."""
    q = linear(q_in, p['wq'], p['bq'])
    k = linear(k_in, p['wk'], p['bk'])
    v = linear(v_in, p['wv'], p['bv'])
    dh = q.shape[-1] // nheads
    return flash_attention(q, k, v, mask_logits, 1.0 / math.sqrt(dh), nheads)


def prediction_heads(output, mask_features, target_size, params):
    dec_out = layer_norm(output, params['decoder_norm_g'],
                         params['decoder_norm_b'])
    cls = linear(dec_out, params['cls_w'], params['cls_b'],
                 out_dtype=jnp.float32)
    me = linear(dec_out, params['mlp_w1'], params['mlp_b1'], relu=True)
    me = linear(me, params['mlp_w2'], params['mlp_b2'], relu=True)
    me = linear(me, params['mlp_w3'], params['mlp_b3'])
    B, Hm, Wm, Cm = mask_features.shape
    Q = me.shape[1]
    mf = mask_features.reshape(B, Hm * Wm, Cm)
    masks = mask_einsum(me, mf).reshape(B, Q, Hm, Wm)      # f32 'bqc,bchw->bqhw'
    Ht, Wt = target_size
    # Only the SIGN of the resized logits feeds the attention mask
    # (sigmoid(x) < 0.5  <=>  x < 0), so the resize runs in bf16 and the
    # threshold is evaluated inside the attention kernel -- no HBM f32
    # additive-mask tensor is materialized.
    am = jax.image.resize(masks.astype(jnp.bfloat16), (B, Q, Ht, Wt),
                          method='bilinear', antialias=False)
    return cls, masks, am.reshape(B, Q, Ht * Wt)


def predictor_forward(ms_feats, mask_features, params, cfg):
    nheads = cfg['nheads']
    D = cfg['hidden']
    B = ms_feats[0].shape[0]
    Q = cfg['num_queries']
    num_levels = cfg['num_levels']

    src, pos, size_list = [], [], []
    for i, x in enumerate(ms_feats):
        _, H, W, C = x.shape
        size_list.append((H, W))
        pos.append(sine_pos_embed(B, H, W, D // 2).reshape(B, H * W, D))
        src.append(x.reshape(B, H * W, C)
                   + params['level_embed'][i][None, None, :])

    query_embed = jnp.broadcast_to(params['query_embed'][None], (B, Q, D))
    output = jnp.broadcast_to(params['query_feat'][None], (B, Q, D))

    pred_classes, pred_masks = [], []
    cls, msk, attn_mask = prediction_heads(output, mask_features,
                                           size_list[0], params)
    pred_classes.append(cls)
    pred_masks.append(msk)

    for i in range(cfg['dec_layers']):
        lvl = i % num_levels
        lp = params['dec'][i]
        # masked cross-attention (+ fused out-proj / residual / LayerNorm)
        attn = mha(output + query_embed, src[lvl] + pos[lvl], src[lvl],
                   attn_mask, lp['cross'], nheads)
        output = linear_res_ln(attn, lp['cross']['wo'], lp['cross']['bo'],
                               output, lp['cross']['norm_g'],
                               lp['cross']['norm_b'])
        # self-attention: dedicated no-mask kernel variant
        qk = output + query_embed
        attn = mha(qk, qk, output, None, lp['self'], nheads)
        output = linear_res_ln(attn, lp['self']['wo'], lp['self']['bo'],
                               output, lp['self']['norm_g'],
                               lp['self']['norm_b'])
        # FFN (+ fused residual / LayerNorm)
        hidden = linear(output, lp['ffn']['w1'], lp['ffn']['b1'], relu=True)
        output = linear_res_ln(hidden, lp['ffn']['w2'], lp['ffn']['b2'],
                               output, lp['ffn']['norm_g'],
                               lp['ffn']['norm_b'])

        cls, msk, attn_mask = prediction_heads(
            output, mask_features, size_list[(i + 1) % num_levels], params)
        pred_classes.append(cls)
        pred_masks.append(msk)

    return {
        'pred_logits': pred_classes[-1],
        'pred_masks': pred_masks[-1],
        'aux_outputs': [{'pred_logits': a, 'pred_masks': b}
                        for a, b in zip(pred_classes[:-1], pred_masks[:-1])],
    }


def mask2former_head_forward(features_nhwc, params, cfg):
    mask_features, _enc_feat, ms_feats = pixel_decoder_forward(
        features_nhwc, params['pixel_decoder'], cfg)
    return predictor_forward(ms_feats, mask_features, params['predictor'], cfg)


# ============================================================================
# Deterministic parameter init
# ============================================================================

class ParamGen:
    def __init__(self, key):
        self.key = key
        self.count = 0

    def __call__(self, *shape, scale=0.02):
        self.count += 1
        k = jax.random.fold_in(self.key, self.count)
        return scale * jax.random.normal(k, shape, dtype=jnp.float32)

    @staticmethod
    def ones(*shape):
        return jnp.ones(shape, jnp.float32)

    @staticmethod
    def zeros(*shape):
        return jnp.zeros(shape, jnp.float32)


def init_params(pg, cfg, in_channels):
    D = cfg['conv_dim']
    P = {'pixel_decoder': {}, 'predictor': {}}

    pd = P['pixel_decoder']
    pd['input_proj'] = []
    for name in ['res5', 'res4', 'res3']:
        Cin = in_channels[name]
        pd['input_proj'].append(dict(w=pg(Cin, D), b=pg(D),
                                     gn_g=pg.ones(D), gn_b=pg.zeros(D)))
    pd['level_embed'] = pg(cfg['num_levels'], D)
    pd['enc_layers'] = []
    H, L, K = cfg['nheads'], cfg['num_levels'], cfg['num_points']
    for _ in range(cfg['enc_layers']):
        attn = dict(value_w=pg(D, D), value_b=pg(D),
                    off_w=pg(D, H * L * K * 2), off_b=pg(H * L * K * 2),
                    attn_w=pg(D, H * L * K), attn_b=pg(H * L * K),
                    out_w=pg(D, D), out_b=pg(D))
        pd['enc_layers'].append(dict(
            attn=attn,
            norm1_g=pg.ones(D), norm1_b=pg.zeros(D),
            ffn1_w=pg(D, cfg['enc_ffn']), ffn1_b=pg(cfg['enc_ffn']),
            ffn2_w=pg(cfg['enc_ffn'], D), ffn2_b=pg(D),
            norm2_g=pg.ones(D), norm2_b=pg.zeros(D)))
    pd['lateral'] = dict(w=pg(in_channels['res2'], D), b=pg(D),
                         gn_g=pg.ones(D), gn_b=pg.zeros(D))
    pd['output'] = dict(w=pg(3, 3, D, D), b=pg(D),
                        gn_g=pg.ones(D), gn_b=pg.zeros(D))
    pd['mask_feat_w'] = pg(D, cfg['mask_dim'])
    pd['mask_feat_b'] = pg(cfg['mask_dim'])

    pr = P['predictor']
    Dh = cfg['hidden']
    pr['level_embed'] = pg(cfg['num_levels'], Dh)
    pr['query_feat'] = pg(cfg['num_queries'], Dh)
    pr['query_embed'] = pg(cfg['num_queries'], Dh)

    def mha_params():
        return dict(wq=pg(Dh, Dh), bq=pg(Dh), wk=pg(Dh, Dh), bk=pg(Dh),
                    wv=pg(Dh, Dh), bv=pg(Dh), wo=pg(Dh, Dh), bo=pg(Dh),
                    norm_g=pg.ones(Dh), norm_b=pg.zeros(Dh))

    pr['dec'] = []
    for _ in range(cfg['dec_layers']):
        pr['dec'].append(dict(
            cross=mha_params(), self=mha_params(),
            ffn=dict(w1=pg(Dh, cfg['dec_ffn']), b1=pg(cfg['dec_ffn']),
                     w2=pg(cfg['dec_ffn'], Dh), b2=pg(Dh),
                     norm_g=pg.ones(Dh), norm_b=pg.zeros(Dh))))
    pr['decoder_norm_g'] = pg.ones(Dh)
    pr['decoder_norm_b'] = pg.zeros(Dh)
    pr['cls_w'] = pg(Dh, cfg['num_classes'] + 1)
    pr['cls_b'] = pg(cfg['num_classes'] + 1)
    pr['mlp_w1'] = pg(Dh, Dh)
    pr['mlp_b1'] = pg(Dh)
    pr['mlp_w2'] = pg(Dh, Dh)
    pr['mlp_b2'] = pg(Dh)
    pr['mlp_w3'] = pg(Dh, cfg['mask_dim'])
    pr['mlp_b3'] = pg(cfg['mask_dim'])
    return P


# ============================================================================
# Main
# ============================================================================

if __name__ == "__main__":
    key = jax.random.PRNGKey(0)
    # Small, architecture-consistent config (full model: 256 dims, 8 heads,
    # 6 enc / 9 dec layers, 100 queries, 150 classes).
    cfg = dict(conv_dim=32, hidden=32, mask_dim=32, nheads=4, num_levels=3,
               num_points=2, enc_layers=2, dec_layers=3, num_queries=8,
               num_classes=10, enc_ffn=64, dec_ffn=64, gn_groups=4)
    in_channels = {'res2': 8, 'res3': 16, 'res4': 32, 'res5': 64}
    spatial = {'res2': 16, 'res3': 8, 'res4': 4, 'res5': 2}
    batch = 2

    # Build PyTorch-style NCHW multi-scale features, then convert to NHWC.
    feats_nchw = {}
    for i, name in enumerate(['res2', 'res3', 'res4', 'res5']):
        k = jax.random.fold_in(key, 100 + i)
        feats_nchw[name] = jax.random.normal(
            k, (batch, in_channels[name], spatial[name], spatial[name]),
            jnp.float32)
    feats = {n: jnp.transpose(v, (0, 2, 3, 1)) for n, v in feats_nchw.items()}

    pg = ParamGen(jax.random.fold_in(key, 7))
    params = init_params(pg, cfg, in_channels)
    # Store matmul / conv / embedding weights in bf16 once; 1-D parameters
    # (biases, norm scales/shifts) stay f32.
    params = jax.tree_util.tree_map(
        lambda a: a.astype(jnp.bfloat16) if a.ndim >= 2 else a, params)

    # TODO(synk): training-time SetCriterion / HungarianMatcher losses are not
    # part of the forward pass and are not implemented.
    out = mask2former_head_forward(feats, params, cfg)
    jax.block_until_ready(out)

    assert out['pred_logits'].shape == (batch, cfg['num_queries'],
                                        cfg['num_classes'] + 1)
    assert out['pred_masks'].shape == (batch, cfg['num_queries'],
                                       spatial['res2'], spatial['res2'])
    assert len(out['aux_outputs']) == cfg['dec_layers']
    print("KERNEL_OK")
</pallas_src>

<mosaic_0001>
module attributes {stable_mosaic.version = 11 : i64} {
  func.func @_matmul_kernel(%arg0: i32, %arg1: i32, %arg2: i32, %arg3: memref<8x128xbf16, #tpu.memory_space<vmem>>, %arg4: memref<128x128xbf16, #tpu.memory_space<vmem>>, %arg5: memref<1x128xf32, #tpu.memory_space<vmem>>, %arg6: memref<8x128xbf16, #tpu.memory_space<vmem>>, %arg7: memref<8x128xf32, #tpu.memory_space<vmem>>) attributes {dimension_semantics = [#tpu.dimension_semantics<parallel>, #tpu.dimension_semantics<parallel>, #tpu.dimension_semantics<arbitrary>], iteration_bounds = array<i64: 1, 1, 1>, scalar_prefetch = 0 : i64, scratch_operands = 1 : i64, tpu.core_type = #tpu.core_type<tc>, window_params = [{transform_indices = @transform_0, window_bounds = array<i64: 8, 128>}, {transform_indices = @transform_1, window_bounds = array<i64: 128, 128>}, {transform_indices = @transform_2, window_bounds = array<i64: 1, 128>}, {transform_indices = @transform_3, window_bounds = array<i64: 8, 128>}]} {
    %c0_i32 = arith.constant 0 : i32
    %0 = arith.cmpi eq, %arg2, %c0_i32 : i32
    %1 = arith.extui %0 : i1 to i32
    %c0_i32_0 = arith.constant 0 : i32
    %2 = arith.cmpi ne, %1, %c0_i32_0 : i32
    scf.if %2 {
      %cst_10 = arith.constant 0.000000e+00 : f32
      %12 = vector.broadcast %cst_10 : f32 to vector<8x128xf32>
      %c0_11 = arith.constant 0 : index
      %c0_12 = arith.constant 0 : index
      %13 = vector.load %arg7[%c0_11, %c0_12] : memref<8x128xf32, #tpu.memory_space<vmem>>, vector<8x128xf32>
      tpu.vector_store %arg7[%c0_11, %c0_12], %12 {strides = array<i32>} : memref<8x128xf32, #tpu.memory_space<vmem>>, vector<8x128xf32>,
    } else {
    }
    %c0 = arith.constant 0 : index
    %c0_1 = arith.constant 0 : index
    %3 = vector.load %arg7[%c0, %c0_1] : memref<8x128xf32, #tpu.memory_space<vmem>>, vector<8x128xf32>
    %c0_2 = arith.constant 0 : index
    %c0_3 = arith.constant 0 : index
    %4 = vector.load %arg3[%c0_2, %c0_3] : memref<8x128xbf16, #tpu.memory_space<vmem>>, vector<8x128xbf16>
    %c0_4 = arith.constant 0 : index
    %c0_5 = arith.constant 0 : index
    %5 = vector.load %arg4[%c0_4, %c0_5] : memref<128x128xbf16, #tpu.memory_space<vmem>>, vector<128x128xbf16>
    %cst = arith.constant dense<0.000000e+00> : vector<8x128xf32>
    %6 = tpu.matmul %4, %5, %cst {dimension_numbers = #tpu.dot_dimension_numbers<[1], [0], [0], [1], [0, 0, 1, 1], [], []>} : vector<8x128xbf16>, vector<128x128xbf16>, vector<8x128xf32> -> vector<8x128xf32>
    %7 = arith.addf %3, %6 : vector<8x128xf32>
    %c0_6 = arith.constant 0 : index
    %c0_7 = arith.constant 0 : index
    %8 = vector.load %arg7[%c0_6, %c0_7] : memref<8x128xf32, #tpu.memory_space<vmem>>, vector<8x128xf32>
    tpu.vector_store %arg7[%c0_6, %c0_7], %7 {strides = array<i32>} : memref<8x128xf32, #tpu.memory_space<vmem>>, vector<8x128xf32>,
    %c0_i32_8 = arith.constant 0 : i32
    %9 = arith.cmpi eq, %arg2, %c0_i32_8 : i32
    %10 = arith.extui %9 : i1 to i32
    %c0_i32_9 = arith.constant 0 : i32
    %11 = arith.cmpi ne, %10, %c0_i32_9 : i32
    scf.if %11 {
      %c0_10 = arith.constant 0 : index
      %c0_11 = arith.constant 0 : index
      %12 = vector.load %arg7[%c0_10, %c0_11] : memref<8x128xf32, #tpu.memory_space<vmem>>, vector<8x128xf32>
      %c0_12 = arith.constant 0 : index
      %c0_13 = arith.constant 0 : index
      %13 = vector.load %arg5[%c0_12, %c0_13] : memref<1x128xf32, #tpu.memory_space<vmem>>, vector<1x128xf32>
      %14 = vector.broadcast %13 : vector<1x128xf32> to vector<8x128xf32>
      %15 = arith.addf %12, %14 : vector<8x128xf32>
      %16 = arith.truncf %15 : vector<8x128xf32> to vector<8x128xbf16>
      %c0_14 = arith.constant 0 : index
      %c0_15 = arith.constant 0 : index
      %17 = vector.load %arg6[%c0_14, %c0_15] : memref<8x128xbf16, #tpu.memory_space<vmem>>, vector<8x128xbf16>
      tpu.vector_store %arg6[%c0_14, %c0_15], %16 {strides = array<i32>} : memref<8x128xbf16, #tpu.memory_space<vmem>>, vector<8x128xbf16>,
    } else {
    }
    return
  }
  func.func @transform_0(%arg0: i32, %arg1: i32, %arg2: i32) -> (i32, i32) {
    %c0_i32 = arith.constant 0 : i32
    return %arg0, %arg2 : i32, i32
  }
  func.func @transform_1(%arg0: i32, %arg1: i32, %arg2: i32) -> (i32, i32) {
    %c0_i32 = arith.constant 0 : i32
    return %arg2, %arg1 : i32, i32
  }
  func.func @transform_2(%arg0: i32, %arg1: i32, %arg2: i32) -> (i32, i32) {
    %c0_i32 = arith.constant 0 : i32
    %c0_i32_0 = arith.constant 0 : i32
    return %c0_i32, %arg1 : i32, i32
  }
  func.func @transform_3(%arg0: i32, %arg1: i32, %arg2: i32) -> (i32, i32) {
    %c0_i32 = arith.constant 0 : i32
    return %arg0, %arg1 : i32, i32
  }
}

</mosaic_0001>

<bundles_post_ra>
// kernel: tpu_custom_call.1
= control target key start
LH: loop header
LB: loop body
LE: loop exit
PB: predicated region body
PF: predicated region fallthrough
CT: control target
= control target key end

     0   :  { %8 = vsyncpa [#allocation4], 0  ;;  %s321_s0 = inlined_call_operand.hbm [shape: bf16[8,128], index: 0, kind: input, shape index: {}]   ;;  %s322_s1 = inlined_call_operand.hbm [shape: bf16[128,128], index: 1, kind: input, shape index: {}]   ;;  %s323_s2 = inlined_call_operand.vmem [shape: f32[1,128], index: 2, kind: input, shape index: {}]   ;;  %s324_s3 = inlined_call_operand.hbm [shape: bf16[8,128], index: 3, kind: output, shape index: {}]  }
   0x1   :  { %9 = vsyncpa [#allocation7], 0 }
   0x2   :  { %10 = vsyncpa [#allocation5], 0  ;;  %s16_s14 = sshll.u32 %s321_s0, 4  ;;  %s284_s15 = smov [#allocation3]   ;;  %s17_s14 = int_to_ptr.hbm [resolvable:$true] %s16_s14 }
   0x3   :  { %s18_s16 = sshll.u32 %s284_s15, 4  ;;  %s26_s19 = sshll.u32 %s322_s1, 4  ;;  %s19_s16 = int_to_ptr.vmem [resolvable:$true] %s18_s16  ;;  %s27_s19 = int_to_ptr.hbm [resolvable:$true] %s26_s19 }
   0x4   :  { %21 = dma.hbm_to_vmem [thread:$0]  %s17_s14, 64, %s19_s16, [#allocation4]  }
   0x5   :  { %s285_s20 = smov [#allocation6]   ;;  %s286_s22 = smov 64  }
   0x6   :  { %s28_s21 = sshll.u32 %s285_s20, 4  ;;  %s287_s23 = smov 4   ;;  %s29_s21 = int_to_ptr.vmem [resolvable:$true] %s28_s21 }
   0x7   :  { %34 = dma.hbm_to_vmem [thread:$0]  %s27_s19, 1024, %s29_s21, [#allocation7], %s286_s22, %s286_s22, %s287_s23  }
   0x8   :  { %278 = dma.done.wait [#allocation4], 64  }
   0x9   :  { %279 = vsyncadd [#allocation4], 4294967232 }
   0xa   :  { %280 = dma.done.wait [#allocation7], 1024  }
   0xb   :  { %281 = vsyncadd [#allocation7], 4294966272  ;;  %v199_v0 = vld [vmem:[#allocation6 + $0x38] sm:$0xff]  ;;  %v198_v1 = vld [vmem:[#allocation6 + $0x30] sm:$0xff]  ;;  %s288_s24 = smov [#allocation8]   ;;  %s149_s28 = sshll.u32 %s324_s3, 4  ;;  %s150_s28 = int_to_ptr.hbm [resolvable:$true] %s149_s28 }
   0xc   :  { %116 = vmatpush.bf16.msra.mxu0 %v199_v0  ;;  %v197_v2 = vld [vmem:[#allocation6 + $0x28] sm:$0xff]  ;;  %v196_v3 = vld [vmem:[#allocation6 + $0x20] sm:$0xff]  ;;  %v195_v4 = vld [vmem:[#allocation6 + $0x18] sm:$0xff]  ;;  %s147_s25 = sshll.u32 %s288_s24, 4  ;;  %s148_s25 = int_to_ptr.vmem [resolvable:$true] %s147_s25 }
   0xd   :  { %v194_v5 = vld [vmem:[#allocation6 + $0x10] sm:$0xff]  ;;  %v193_v6 = vld [vmem:[#allocation6 + $0x8] sm:$0xff]  ;;  %v192_v7 = vld [vmem:[#allocation6] sm:$0xff] }
   0xe   :  { %v51_v8 = vld [vmem:[#allocation3] sm:$0xf] }
   0xf   :  { %v205_v9 = vld [vmem:[%s323_s2] ss:$0 sm:$0xff] }
  0x10   :  { %117 = vmatpush.bf16.msra.mxu0 %v198_v1 }
  0x14   :  { %118 = vmatpush.bf16.msra.mxu0 %v197_v2 }
  0x18   :  { %119 = vmatpush.bf16.msra.mxu0 %v196_v3 }
  0x1c   :  { %120 = vmatpush.bf16.msra.mxu0 %v195_v4 }
  0x20   :  { %121 = vmatpush.bf16.msra.mxu0 %v194_v5 }
  0x24   :  { %122 = vmatpush.bf16.msra.mxu0 %v193_v6 }
  0x28   :  { %123 = vmatpush.bf16.msra.mxu0 %v192_v7 }
  0x2b   :  { %124 = vmatmul.bf16.vlgmr.msra.gmra.mxu0 %v51_v8 }
  0xa8   :  { %v125_v10 = vpop.f32.mrf.mxu0 }
  0xa9   :  { %v139_v11 = vadd.f32 %v205_v9, %v125_v10 }
  0xab   :  { %v140_v12 = vpack.c.bf16 %v139_v11, %v139_v11 }
  0xad   :  { %141 = vst [vmem:[#allocation8] sm:$0xf] %v140_v12 }
  0xae   :  { %152 = dma.vmem_to_hbm [thread:$0]  %s148_s25, 64, %s150_s28, [#allocation5]  }
  0xb0   :  { %v127_v13 = vpop.f32.mrf.mxu0 }
  0xb1   :  { %282 = dma.done.wait [#allocation5], 64  }
  0xb2   :  { %283 = vsyncadd [#allocation5], 4294967232 }
  0xb3   :  { %157 = vsyncpa [#allocation4], 1 }
  0xb4   :  { %158 = vsyncpa [#allocation7], 1 }
  0xb5   :  { %159 = vsyncpa [#allocation5], 1 }

</bundles_post_ra>
